<compile_context>
chip_gen: v7x
topology: tpu7x:2x2x1
jax: 0.10.0
libtpu: 0.0.40
codegen_flags: <defaults>
</compile_context>

<pallas_src>
import math
import numpy as np
import jax
import jax.numpy as jnp
from jax.experimental import pallas as pl
from jax.experimental.pallas import tpu as pltpu


def _round_up(x: int, m: int) -> int:
    return (x + m - 1) // m * m


def _frames_per_tile(hop: int, h_needed: int, tb: int,
                     m_target: int = 256, tf_max: int = 64) -> int:
    """Frames per grid step.  TF keeps TF % 8 == 0 (sublane tiling of the x
    block) and (TF*hop) % 128 == 0 (lane-dense, unmasked output stores)."""
    base = 128 // math.gcd(hop, 128)
    base = base * 8 // math.gcd(base, 8)          # lcm(base, 8)
    cap = max(base, min(tf_max, _round_up(h_needed, base)))
    tf = base
    while tf * 2 <= cap and tb * tf < m_target:   # fill MXU M, bound the OLA unroll
        tf *= 2
    return tf


def _make_imdct2_kernel(hop, tf, win_pad, tw):
    def kernel(x_ref, w_ref, o_ref, acc_ref):
        # x_ref  : (TB, TF, n_fft)      frame tile of the input spectra
        # w_ref  : (n_fft, win_pad)     fused idct/2 * window weights (constant)
        # o_ref  : (TB, TW = TF*hop)    non-overlapping output strip of this tile
        # acc_ref: (TB, TW + win_pad)   running overlap-add span (carried across f)
        f = pl.program_id(1)

        @pl.when(f == 0)
        def _init():
            acc_ref[...] = jnp.zeros_like(acc_ref)

        tb, _, n_fft = x_ref.shape

        # One MXU matmul per grid step; frames (and batch rows) fill M.
        y = jnp.dot(x_ref[...].reshape(tb * tf, n_fft), w_ref[...],
                    preferred_element_type=jnp.float32)
        y = y.reshape(tb, tf, win_pad)

        # Overlap-add into the span accumulator.  Offsets i*hop are static
        # Python ints (fully lane-aligned whenever hop % 128 == 0, the common
        # audio case: hop = 128 / 256 / 512).
        for i in range(tf):
            s = i * hop
            acc_ref[:, s:s + win_pad] += y[:, i, :]

        # Emit the finished, non-overlapping strip (aligned, lane-dense store)
        # and shift the remaining tail forward as the carry for the next tile.
        o_ref[...] = acc_ref[:, :tw]
        tail = acc_ref[:, tw:tw + win_pad]        # loaded before the overwrite below
        acc_ref[:, :win_pad] = tail
        acc_ref[:, win_pad:] = jnp.zeros((tb, tw), jnp.float32)

    return kernel


def imdct2(signal, idct_mat, window, hop_length, win_length,
           center=True, out_length=None):
    """Pallas implementation of IMDCT2.forward.

    signal   : (B, H, n_fft) float32
    idct_mat : (n_fft, n_fft) float32, idct(x) == x @ idct_mat
    window   : (win_length,) float32
    """
    B, H, n_fft = signal.shape
    win, hop = int(win_length), int(hop_length)
    assert win <= n_fft, "window length must be <= n_fft"
    assert hop <= win, "hop length must be <= window length"

    # Tiny fused weight matrix: idct/2, truncation to win, window; lane padded.
    win_pad = _round_up(win, 128)
    w_eff = (idct_mat[:, :win].astype(jnp.float32)
             * window.astype(jnp.float32)[None, :]) * 0.5
    if win_pad != win:
        w_eff = jnp.pad(w_eff, ((0, 0), (0, win_pad - win)))

    # Tiling.  tb = B for small B avoids throwaway padded-batch matmuls.
    tb = B if B <= 8 else 8
    b_pad = _round_up(B, tb)
    h_needed = (H - 1) + -(-win // hop)     # frames so every real output column is emitted
    tf = _frames_per_tile(hop, h_needed, tb)
    h_pad = _round_up(h_needed, tf)         # padded (zero) frames contribute nothing
    tw = tf * hop                           # output strip per step (multiple of 128)
    out_cols = h_pad * hop
    out_len = (H - 1) * hop + win

    x = signal.astype(jnp.float32)
    if b_pad != B or h_pad != H:
        x = jnp.pad(x, ((0, b_pad - B), (0, h_pad - H), (0, 0)))

    grid = (b_pad // tb, h_pad // tf)       # (parallel batch, sequential frame tiles)

    # Constant weight block: fetched once; single-buffered to halve its VMEM.
    w_index = lambda b, f: (0, 0)
    try:
        w_spec = pl.BlockSpec((n_fft, win_pad), w_index,
                              pipeline_mode=pl.Buffered(1))
    except (TypeError, AttributeError):     # older BlockSpec without pipeline_mode
        w_spec = pl.BlockSpec((n_fft, win_pad), w_index)

    flops = 2 * b_pad * h_pad * n_fft * win_pad
    bytes_accessed = 4 * (b_pad * h_pad * n_fft + n_fft * win_pad + b_pad * out_cols)
    vmem_est = 4 * (n_fft * win_pad               # W (single buffer)
                    + 2 * tb * tf * n_fft         # x  (double buffered)
                    + 2 * tb * tw                 # out (double buffered)
                    + tb * (tw + win_pad))        # span accumulator
    vmem_limit = int(max(32 * 2**20, min(2 * vmem_est, 64 * 2**20)))  # v7x-safe cap

    out = pl.pallas_call(
        _make_imdct2_kernel(hop, tf, win_pad, tw),
        out_shape=jax.ShapeDtypeStruct((b_pad, out_cols), jnp.float32),
        grid=grid,
        in_specs=[
            pl.BlockSpec((tb, tf, n_fft), lambda b, f: (b, f, 0)),
            w_spec,
        ],
        out_specs=pl.BlockSpec((tb, tw), lambda b, f: (b, f)),
        scratch_shapes=[pltpu.VMEM((tb, tw + win_pad), jnp.float32)],
        compiler_params=pltpu.CompilerParams(
            dimension_semantics=("parallel", "arbitrary"),
            vmem_limit_bytes=vmem_limit),
        cost_estimate=pl.CostEstimate(flops=flops, transcendentals=0,
                                      bytes_accessed=bytes_accessed),
    )(x, w_eff)

    # Strip batch/frame padding, restore fold's (B, 1, 1, L) layout, then crop.
    out = out[:B, :out_len].reshape(B, 1, 1, out_len)
    if center:
        out = out[..., win // 2: -win // 2]       # same expression as the torch module
    if out_length is not None:
        out = out[..., :out_length]
    return out


if __name__ == "__main__":
    # Small, self-consistent configuration (hop is 128-aligned, the common audio case).
    B, H = 2, 8            # batch, number of frames
    n_fft = 256
    win_length = 192
    hop_length = 128

    key = jax.random.PRNGKey(0)
    x = jax.random.normal(key, (B, H, n_fft), dtype=jnp.float32)

    # Deterministic "parameters":
    # IDCT-II (orthonormal) basis: idct(v)[n] = sum_k v[k] * c_k * cos(pi*k*(n+0.5)/N)
    k_idx = np.arange(n_fft, dtype=np.float64)[:, None]
    n_idx = np.arange(n_fft, dtype=np.float64)[None, :]
    c = np.full((n_fft, 1), np.sqrt(2.0 / n_fft))
    c[0, 0] = np.sqrt(1.0 / n_fft)
    idct_mat_np = (c * np.cos(np.pi * k_idx * (n_idx + 0.5) / n_fft)).astype(np.float32)
    # Hann-style window (deterministic, non-trivial).
    window_np = (0.5 - 0.5 * np.cos(
        2.0 * np.pi * np.arange(win_length) / win_length)).astype(np.float32)

    out = imdct2(x, jnp.asarray(idct_mat_np), jnp.asarray(window_np),
                 hop_length, win_length, center=True, out_length=None)
    out = jax.block_until_ready(out)

    # Pure-numpy reference of the PyTorch forward semantics.
    xn = np.asarray(x, dtype=np.float64)
    y = xn @ idct_mat_np.astype(np.float64) / 2.0             # idct(signal) / 2
    y = y[..., :win_length] * window_np.astype(np.float64)    # truncate + window
    out_len = (H - 1) * hop_length + win_length
    ref = np.zeros((B, out_len), dtype=np.float64)
    for t in range(H):                                         # fold (overlap-add)
        ref[:, t * hop_length:t * hop_length + win_length] += y[:, t, :]
    ref = ref.reshape(B, 1, 1, out_len)[..., win_length // 2: -win_length // 2]

    assert out.shape == ref.shape, (out.shape, ref.shape)
    np.testing.assert_allclose(np.asarray(out), ref, rtol=1e-4, atol=1e-4)
    print("KERNEL_OK")
</pallas_src>

<mosaic_0001>
module attributes {stable_mosaic.version = 11 : i64} {
  func.func @kernel(%arg0: i32, %arg1: i32, %arg2: memref<2x16x256xf32, #tpu.memory_space<vmem>>, %arg3: memref<256x256xf32, #tpu.memory_space<vmem>>, %arg4: memref<2x2048xf32, #tpu.memory_space<vmem>>, %arg5: memref<2x2304xf32, #tpu.memory_space<vmem>>) attributes {dimension_semantics = [#tpu.dimension_semantics<parallel>, #tpu.dimension_semantics<arbitrary>], iteration_bounds = array<i64: 1, 1>, scalar_prefetch = 0 : i64, scratch_operands = 1 : i64, tpu.core_type = #tpu.core_type<tc>, window_params = [{transform_indices = @transform_0, window_bounds = array<i64: 2, 16, 256>}, {pipeline_mode = #tpu.pipeline_mode<synchronous>, transform_indices = @transform_1, window_bounds = array<i64: 256, 256>}, {transform_indices = @transform_2, window_bounds = array<i64: 2, 2048>}]} {
    %c0_i32 = arith.constant 0 : i32
    %0 = arith.cmpi eq, %arg1, %c0_i32 : i32
    %1 = arith.extui %0 : i1 to i32
    %c0_i32_0 = arith.constant 0 : i32
    %2 = arith.cmpi ne, %1, %c0_i32_0 : i32
    scf.if %2 {
      %cst_64 = arith.constant 0.000000e+00 : f32
      %94 = vector.broadcast %cst_64 : f32 to vector<2x2304xf32>
      %c0_65 = arith.constant 0 : index
      %c0_66 = arith.constant 0 : index
      %95 = vector.load %arg5[%c0_65, %c0_66] : memref<2x2304xf32, #tpu.memory_space<vmem>>, vector<2x2304xf32>
      tpu.vector_store %arg5[%c0_65, %c0_66], %94 {strides = array<i32>} : memref<2x2304xf32, #tpu.memory_space<vmem>>, vector<2x2304xf32>,
    } else {
    }
    %c0 = arith.constant 0 : index
    %c0_1 = arith.constant 0 : index
    %c0_2 = arith.constant 0 : index
    %3 = vector.load %arg2[%c0, %c0_1, %c0_2] : memref<2x16x256xf32, #tpu.memory_space<vmem>>, vector<2x16x256xf32>
    %4 = vector.shape_cast %3 : vector<2x16x256xf32> to vector<32x256xf32>
    %c0_3 = arith.constant 0 : index
    %c0_4 = arith.constant 0 : index
    %5 = vector.load %arg3[%c0_3, %c0_4] : memref<256x256xf32, #tpu.memory_space<vmem>>, vector<256x256xf32>
    %cst = arith.constant dense<0.000000e+00> : vector<32x256xf32>
    %6 = tpu.matmul %4, %5, %cst {dimension_numbers = #tpu.dot_dimension_numbers<[1], [0], [0], [1], [0, 0, 1, 1], [], []>} : vector<32x256xf32>, vector<256x256xf32>, vector<32x256xf32> -> vector<32x256xf32>
    %7 = vector.shape_cast %6 : vector<32x256xf32> to vector<2x16x256xf32>
    %c0_5 = arith.constant 0 : index
    %c0_6 = arith.constant 0 : index
    %8 = vector.load %arg5[%c0_5, %c0_6] : memref<2x2304xf32, #tpu.memory_space<vmem>>, vector<2x256xf32>
    %9 = vector.extract_strided_slice %7 {offsets = [0, 0, 0], sizes = [2, 1, 256], strides = [1, 1, 1]} : vector<2x16x256xf32> to vector<2x1x256xf32>
    %10 = vector.shape_cast %9 : vector<2x1x256xf32> to vector<2x256xf32>
    %11 = arith.addf %8, %10 : vector<2x256xf32>
    %c0_7 = arith.constant 0 : index
    %c0_8 = arith.constant 0 : index
    %12 = vector.load %arg5[%c0_7, %c0_8] : memref<2x2304xf32, #tpu.memory_space<vmem>>, vector<2x256xf32>
    tpu.vector_store %arg5[%c0_7, %c0_8], %11 {strides = array<i32>} : memref<2x2304xf32, #tpu.memory_space<vmem>>, vector<2x256xf32>,
    %c0_9 = arith.constant 0 : index
    %c128 = arith.constant 128 : index
    %13 = vector.load %arg5[%c0_9, %c128] : memref<2x2304xf32, #tpu.memory_space<vmem>>, vector<2x256xf32>
    %14 = vector.extract_strided_slice %7 {offsets = [0, 1, 0], sizes = [2, 1, 256], strides = [1, 1, 1]} : vector<2x16x256xf32> to vector<2x1x256xf32>
    %15 = vector.shape_cast %14 : vector<2x1x256xf32> to vector<2x256xf32>
    %16 = arith.addf %13, %15 : vector<2x256xf32>
    %c0_10 = arith.constant 0 : index
    %c128_11 = arith.constant 128 : index
    %17 = vector.load %arg5[%c0_10, %c128_11] : memref<2x2304xf32, #tpu.memory_space<vmem>>, vector<2x256xf32>
    tpu.vector_store %arg5[%c0_10, %c128_11], %16 {strides = array<i32>} : memref<2x2304xf32, #tpu.memory_space<vmem>>, vector<2x256xf32>,
    %c0_12 = arith.constant 0 : index
    %c256 = arith.constant 256 : index
    %18 = vector.load %arg5[%c0_12, %c256] : memref<2x2304xf32, #tpu.memory_space<vmem>>, vector<2x256xf32>
    %19 = vector.extract_strided_slice %7 {offsets = [0, 2, 0], sizes = [2, 1, 256], strides = [1, 1, 1]} : vector<2x16x256xf32> to vector<2x1x256xf32>
    %20 = vector.shape_cast %19 : vector<2x1x256xf32> to vector<2x256xf32>
    %21 = arith.addf %18, %20 : vector<2x256xf32>
    %c0_13 = arith.constant 0 : index
    %c256_14 = arith.constant 256 : index
    %22 = vector.load %arg5[%c0_13, %c256_14] : memref<2x2304xf32, #tpu.memory_space<vmem>>, vector<2x256xf32>
    tpu.vector_store %arg5[%c0_13, %c256_14], %21 {strides = array<i32>} : memref<2x2304xf32, #tpu.memory_space<vmem>>, vector<2x256xf32>,
    %c0_15 = arith.constant 0 : index
    %c384 = arith.constant 384 : index
    %23 = vector.load %arg5[%c0_15, %c384] : memref<2x2304xf32, #tpu.memory_space<vmem>>, vector<2x256xf32>
    %24 = vector.extract_strided_slice %7 {offsets = [0, 3, 0], sizes = [2, 1, 256], strides = [1, 1, 1]} : vector<2x16x256xf32> to vector<2x1x256xf32>
    %25 = vector.shape_cast %24 : vector<2x1x256xf32> to vector<2x256xf32>
    %26 = arith.addf %23, %25 : vector<2x256xf32>
    %c0_16 = arith.constant 0 : index
    %c384_17 = arith.constant 384 : index
    %27 = vector.load %arg5[%c0_16, %c384_17] : memref<2x2304xf32, #tpu.memory_space<vmem>>, vector<2x256xf32>
    tpu.vector_store %arg5[%c0_16, %c384_17], %26 {strides = array<i32>} : memref<2x2304xf32, #tpu.memory_space<vmem>>, vector<2x256xf32>,
    %c0_18 = arith.constant 0 : index
    %c512 = arith.constant 512 : index
    %28 = vector.load %arg5[%c0_18, %c512] : memref<2x2304xf32, #tpu.memory_space<vmem>>, vector<2x256xf32>
    %29 = vector.extract_strided_slice %7 {offsets = [0, 4, 0], sizes = [2, 1, 256], strides = [1, 1, 1]} : vector<2x16x256xf32> to vector<2x1x256xf32>
    %30 = vector.shape_cast %29 : vector<2x1x256xf32> to vector<2x256xf32>
    %31 = arith.addf %28, %30 : vector<2x256xf32>
    %c0_19 = arith.constant 0 : index
    %c512_20 = arith.constant 512 : index
    %32 = vector.load %arg5[%c0_19, %c512_20] : memref<2x2304xf32, #tpu.memory_space<vmem>>, vector<2x256xf32>
    tpu.vector_store %arg5[%c0_19, %c512_20], %31 {strides = array<i32>} : memref<2x2304xf32, #tpu.memory_space<vmem>>, vector<2x256xf32>,
    %c0_21 = arith.constant 0 : index
    %c640 = arith.constant 640 : index
    %33 = vector.load %arg5[%c0_21, %c640] : memref<2x2304xf32, #tpu.memory_space<vmem>>, vector<2x256xf32>
    %34 = vector.extract_strided_slice %7 {offsets = [0, 5, 0], sizes = [2, 1, 256], strides = [1, 1, 1]} : vector<2x16x256xf32> to vector<2x1x256xf32>
    %35 = vector.shape_cast %34 : vector<2x1x256xf32> to vector<2x256xf32>
    %36 = arith.addf %33, %35 : vector<2x256xf32>
    %c0_22 = arith.constant 0 : index
    %c640_23 = arith.constant 640 : index
    %37 = vector.load %arg5[%c0_22, %c640_23] : memref<2x2304xf32, #tpu.memory_space<vmem>>, vector<2x256xf32>
    tpu.vector_store %arg5[%c0_22, %c640_23], %36 {strides = array<i32>} : memref<2x2304xf32, #tpu.memory_space<vmem>>, vector<2x256xf32>,
    %c0_24 = arith.constant 0 : index
    %c768 = arith.constant 768 : index
    %38 = vector.load %arg5[%c0_24, %c768] : memref<2x2304xf32, #tpu.memory_space<vmem>>, vector<2x256xf32>
    %39 = vector.extract_strided_slice %7 {offsets = [0, 6, 0], sizes = [2, 1, 256], strides = [1, 1, 1]} : vector<2x16x256xf32> to vector<2x1x256xf32>
    %40 = vector.shape_cast %39 : vector<2x1x256xf32> to vector<2x256xf32>
    %41 = arith.addf %38, %40 : vector<2x256xf32>
    %c0_25 = arith.constant 0 : index
    %c768_26 = arith.constant 768 : index
    %42 = vector.load %arg5[%c0_25, %c768_26] : memref<2x2304xf32, #tpu.memory_space<vmem>>, vector<2x256xf32>
    tpu.vector_store %arg5[%c0_25, %c768_26], %41 {strides = array<i32>} : memref<2x2304xf32, #tpu.memory_space<vmem>>, vector<2x256xf32>,
    %c0_27 = arith.constant 0 : index
    %c896 = arith.constant 896 : index
    %43 = vector.load %arg5[%c0_27, %c896] : memref<2x2304xf32, #tpu.memory_space<vmem>>, vector<2x256xf32>
    %44 = vector.extract_strided_slice %7 {offsets = [0, 7, 0], sizes = [2, 1, 256], strides = [1, 1, 1]} : vector<2x16x256xf32> to vector<2x1x256xf32>
    %45 = vector.shape_cast %44 : vector<2x1x256xf32> to vector<2x256xf32>
    %46 = arith.addf %43, %45 : vector<2x256xf32>
    %c0_28 = arith.constant 0 : index
    %c896_29 = arith.constant 896 : index
    %47 = vector.load %arg5[%c0_28, %c896_29] : memref<2x2304xf32, #tpu.memory_space<vmem>>, vector<2x256xf32>
    tpu.vector_store %arg5[%c0_28, %c896_29], %46 {strides = array<i32>} : memref<2x2304xf32, #tpu.memory_space<vmem>>, vector<2x256xf32>,
    %c0_30 = arith.constant 0 : index
    %c1024 = arith.constant 1024 : index
    %48 = vector.load %arg5[%c0_30, %c1024] : memref<2x2304xf32, #tpu.memory_space<vmem>>, vector<2x256xf32>
    %49 = vector.extract_strided_slice %7 {offsets = [0, 8, 0], sizes = [2, 1, 256], strides = [1, 1, 1]} : vector<2x16x256xf32> to vector<2x1x256xf32>
    %50 = vector.shape_cast %49 : vector<2x1x256xf32> to vector<2x256xf32>
    %51 = arith.addf %48, %50 : vector<2x256xf32>
    %c0_31 = arith.constant 0 : index
    %c1024_32 = arith.constant 1024 : index
    %52 = vector.load %arg5[%c0_31, %c1024_32] : memref<2x2304xf32, #tpu.memory_space<vmem>>, vector<2x256xf32>
    tpu.vector_store %arg5[%c0_31, %c1024_32], %51 {strides = array<i32>} : memref<2x2304xf32, #tpu.memory_space<vmem>>, vector<2x256xf32>,
    %c0_33 = arith.constant 0 : index
    %c1152 = arith.constant 1152 : index
    %53 = vector.load %arg5[%c0_33, %c1152] : memref<2x2304xf32, #tpu.memory_space<vmem>>, vector<2x256xf32>
    %54 = vector.extract_strided_slice %7 {offsets = [0, 9, 0], sizes = [2, 1, 256], strides = [1, 1, 1]} : vector<2x16x256xf32> to vector<2x1x256xf32>
    %55 = vector.shape_cast %54 : vector<2x1x256xf32> to vector<2x256xf32>
    %56 = arith.addf %53, %55 : vector<2x256xf32>
    %c0_34 = arith.constant 0 : index
    %c1152_35 = arith.constant 1152 : index
    %57 = vector.load %arg5[%c0_34, %c1152_35] : memref<2x2304xf32, #tpu.memory_space<vmem>>, vector<2x256xf32>
    tpu.vector_store %arg5[%c0_34, %c1152_35], %56 {strides = array<i32>} : memref<2x2304xf32, #tpu.memory_space<vmem>>, vector<2x256xf32>,
    %c0_36 = arith.constant 0 : index
    %c1280 = arith.constant 1280 : index
    %58 = vector.load %arg5[%c0_36, %c1280] : memref<2x2304xf32, #tpu.memory_space<vmem>>, vector<2x256xf32>
    %59 = vector.extract_strided_slice %7 {offsets = [0, 10, 0], sizes = [2, 1, 256], strides = [1, 1, 1]} : vector<2x16x256xf32> to vector<2x1x256xf32>
    %60 = vector.shape_cast %59 : vector<2x1x256xf32> to vector<2x256xf32>
    %61 = arith.addf %58, %60 : vector<2x256xf32>
    %c0_37 = arith.constant 0 : index
    %c1280_38 = arith.constant 1280 : index
    %62 = vector.load %arg5[%c0_37, %c1280_38] : memref<2x2304xf32, #tpu.memory_space<vmem>>, vector<2x256xf32>
    tpu.vector_store %arg5[%c0_37, %c1280_38], %61 {strides = array<i32>} : memref<2x2304xf32, #tpu.memory_space<vmem>>, vector<2x256xf32>,
    %c0_39 = arith.constant 0 : index
    %c1408 = arith.constant 1408 : index
    %63 = vector.load %arg5[%c0_39, %c1408] : memref<2x2304xf32, #tpu.memory_space<vmem>>, vector<2x256xf32>
    %64 = vector.extract_strided_slice %7 {offsets = [0, 11, 0], sizes = [2, 1, 256], strides = [1, 1, 1]} : vector<2x16x256xf32> to vector<2x1x256xf32>
    %65 = vector.shape_cast %64 : vector<2x1x256xf32> to vector<2x256xf32>
    %66 = arith.addf %63, %65 : vector<2x256xf32>
    %c0_40 = arith.constant 0 : index
    %c1408_41 = arith.constant 1408 : index
    %67 = vector.load %arg5[%c0_40, %c1408_41] : memref<2x2304xf32, #tpu.memory_space<vmem>>, vector<2x256xf32>
    tpu.vector_store %arg5[%c0_40, %c1408_41], %66 {strides = array<i32>} : memref<2x2304xf32, #tpu.memory_space<vmem>>, vector<2x256xf32>,
    %c0_42 = arith.constant 0 : index
    %c1536 = arith.constant 1536 : index
    %68 = vector.load %arg5[%c0_42, %c1536] : memref<2x2304xf32, #tpu.memory_space<vmem>>, vector<2x256xf32>
    %69 = vector.extract_strided_slice %7 {offsets = [0, 12, 0], sizes = [2, 1, 256], strides = [1, 1, 1]} : vector<2x16x256xf32> to vector<2x1x256xf32>
    %70 = vector.shape_cast %69 : vector<2x1x256xf32> to vector<2x256xf32>
    %71 = arith.addf %68, %70 : vector<2x256xf32>
    %c0_43 = arith.constant 0 : index
    %c1536_44 = arith.constant 1536 : index
    %72 = vector.load %arg5[%c0_43, %c1536_44] : memref<2x2304xf32, #tpu.memory_space<vmem>>, vector<2x256xf32>
    tpu.vector_store %arg5[%c0_43, %c1536_44], %71 {strides = array<i32>} : memref<2x2304xf32, #tpu.memory_space<vmem>>, vector<2x256xf32>,
    %c0_45 = arith.constant 0 : index
    %c1664 = arith.constant 1664 : index
    %73 = vector.load %arg5[%c0_45, %c1664] : memref<2x2304xf32, #tpu.memory_space<vmem>>, vector<2x256xf32>
    %74 = vector.extract_strided_slice %7 {offsets = [0, 13, 0], sizes = [2, 1, 256], strides = [1, 1, 1]} : vector<2x16x256xf32> to vector<2x1x256xf32>
    %75 = vector.shape_cast %74 : vector<2x1x256xf32> to vector<2x256xf32>
    %76 = arith.addf %73, %75 : vector<2x256xf32>
    %c0_46 = arith.constant 0 : index
    %c1664_47 = arith.constant 1664 : index
    %77 = vector.load %arg5[%c0_46, %c1664_47] : memref<2x2304xf32, #tpu.memory_space<vmem>>, vector<2x256xf32>
    tpu.vector_store %arg5[%c0_46, %c1664_47], %76 {strides = array<i32>} : memref<2x2304xf32, #tpu.memory_space<vmem>>, vector<2x256xf32>,
    %c0_48 = arith.constant 0 : index
    %c1792 = arith.constant 1792 : index
    %78 = vector.load %arg5[%c0_48, %c1792] : memref<2x2304xf32, #tpu.memory_space<vmem>>, vector<2x256xf32>
    %79 = vector.extract_strided_slice %7 {offsets = [0, 14, 0], sizes = [2, 1, 256], strides = [1, 1, 1]} : vector<2x16x256xf32> to vector<2x1x256xf32>
    %80 = vector.shape_cast %79 : vector<2x1x256xf32> to vector<2x256xf32>
    %81 = arith.addf %78, %80 : vector<2x256xf32>
    %c0_49 = arith.constant 0 : index
    %c1792_50 = arith.constant 1792 : index
    %82 = vector.load %arg5[%c0_49, %c1792_50] : memref<2x2304xf32, #tpu.memory_space<vmem>>, vector<2x256xf32>
    tpu.vector_store %arg5[%c0_49, %c1792_50], %81 {strides = array<i32>} : memref<2x2304xf32, #tpu.memory_space<vmem>>, vector<2x256xf32>,
    %c0_51 = arith.constant 0 : index
    %c1920 = arith.constant 1920 : index
    %83 = vector.load %arg5[%c0_51, %c1920] : memref<2x2304xf32, #tpu.memory_space<vmem>>, vector<2x256xf32>
    %84 = vector.extract_strided_slice %7 {offsets = [0, 15, 0], sizes = [2, 1, 256], strides = [1, 1, 1]} : vector<2x16x256xf32> to vector<2x1x256xf32>
    %85 = vector.shape_cast %84 : vector<2x1x256xf32> to vector<2x256xf32>
    %86 = arith.addf %83, %85 : vector<2x256xf32>
    %c0_52 = arith.constant 0 : index
    %c1920_53 = arith.constant 1920 : index
    %87 = vector.load %arg5[%c0_52, %c1920_53] : memref<2x2304xf32, #tpu.memory_space<vmem>>, vector<2x256xf32>
    tpu.vector_store %arg5[%c0_52, %c1920_53], %86 {strides = array<i32>} : memref<2x2304xf32, #tpu.memory_space<vmem>>, vector<2x256xf32>,
    %c0_54 = arith.constant 0 : index
    %c0_55 = arith.constant 0 : index
    %88 = vector.load %arg5[%c0_54, %c0_55] : memref<2x2304xf32, #tpu.memory_space<vmem>>, vector<2x2048xf32>
    %c0_56 = arith.constant 0 : index
    %c0_57 = arith.constant 0 : index
    %89 = vector.load %arg4[%c0_56, %c0_57] : memref<2x2048xf32, #tpu.memory_space<vmem>>, vector<2x2048xf32>
    tpu.vector_store %arg4[%c0_56, %c0_57], %88 {strides = array<i32>} : memref<2x2048xf32, #tpu.memory_space<vmem>>, vector<2x2048xf32>,
    %c0_58 = arith.constant 0 : index
    %c2048 = arith.constant 2048 : index
    %90 = vector.load %arg5[%c0_58, %c2048] : memref<2x2304xf32, #tpu.memory_space<vmem>>, vector<2x256xf32>
    %c0_59 = arith.constant 0 : index
    %c0_60 = arith.constant 0 : index
    %91 = vector.load %arg5[%c0_59, %c0_60] : memref<2x2304xf32, #tpu.memory_space<vmem>>, vector<2x256xf32>
    tpu.vector_store %arg5[%c0_59, %c0_60], %90 {strides = array<i32>} : memref<2x2304xf32, #tpu.memory_space<vmem>>, vector<2x256xf32>,
    %cst_61 = arith.constant 0.000000e+00 : f32
    %92 = vector.broadcast %cst_61 : f32 to vector<2x2048xf32>
    %c0_62 = arith.constant 0 : index
    %c256_63 = arith.constant 256 : index
    %93 = vector.load %arg5[%c0_62, %c256_63] : memref<2x2304xf32, #tpu.memory_space<vmem>>, vector<2x2048xf32>
    tpu.vector_store %arg5[%c0_62, %c256_63], %92 {strides = array<i32>} : memref<2x2304xf32, #tpu.memory_space<vmem>>, vector<2x2048xf32>,
    return
  }
  func.func @transform_0(%arg0: i32, %arg1: i32) -> (i32, i32, i32) {
    %c0_i32 = arith.constant 0 : i32
    %c0_i32_0 = arith.constant 0 : i32
    return %arg0, %arg1, %c0_i32 : i32, i32, i32
  }
  func.func @transform_1(%arg0: i32, %arg1: i32) -> (i32, i32) {
    %c0_i32 = arith.constant 0 : i32
    %c0_i32_0 = arith.constant 0 : i32
    %c0_i32_1 = arith.constant 0 : i32
    return %c0_i32, %c0_i32_0 : i32, i32
  }
  func.func @transform_2(%arg0: i32, %arg1: i32) -> (i32, i32) {
    %c0_i32 = arith.constant 0 : i32
    return %arg0, %arg1 : i32, i32
  }
}

</mosaic_0001>

<bundles_post_ra>
// kernel: tpu_custom_call.1
= control target key start
LH: loop header
LB: loop body
LE: loop exit
PB: predicated region body
PF: predicated region fallthrough
CT: control target
= control target key end

     0   :  { %7 = vsyncpa [#allocation4], 0  ;;  %s840_s0 = inlined_call_operand.hbm [shape: f32[2,16,256], index: 0, kind: input, shape index: {}]   ;;  %s841_s1 = inlined_call_operand.hbm [shape: f32[256,256], index: 1, kind: input, shape index: {}]   ;;  %s842_s2 = inlined_call_operand.hbm [shape: f32[2,2048], index: 2, kind: output, shape index: {}]  }
   0x1   :  { %8 = vsyncpa [#allocation7], 0 }
   0x2   :  { %9 = vsyncpa [#allocation5], 0  ;;  %s677_s9 = smov [#allocation3]   ;;  %s605_s13 = scalar_lea.hbm %s840_s0, 1024 }
   0x3   :  { %s15_s10 = sshll.u32 %s677_s9, 4  ;;  %p606_p0 = scmp.ne.s32.totalorder %s840_s0, %s605_s13  ;;  %s16_s10 = int_to_ptr.vmem [resolvable:$true] %s15_s10 }
   0x4   :  { %p609_p1 = scmp.lt.u32.totalorder %s605_s13, %s840_s0 }
   0x6   :  { %p611_p2 = pnand %p609_p1, %p606_p0 }
   0x8   :  { %614 = shalt.err (!%p611_p2)
}
   0x9   :  { %s615_s18 = scalar_lea.vmem %s16_s10, 1024  ;;  %p620_p4 = scmp.lt.s32.totalorder %s16_s10, %s16_s10 }
   0xa   :  { %p616_p3 = scmp.ne.s32.totalorder %s16_s10, %s615_s18  ;;  %p621_p5 = scmp.lt.s32.totalorder %s615_s18, %s615_s18 }
   0xc   :  { %p622_p6 = por %p621_p5, %p620_p4 }
   0xe   :  { %p623_p7 = pnand %p622_p6, %p616_p3 }
  0x10   :  { %626 = shalt.err (!%p623_p7)
}
  0x11   :  { %s678_s19 = smov 256   ;;  %s679_s20 = smov 16  }
  0x12   :  { %21 = dma.hbm_to_vmem [thread:$0]  %s840_s0, 1024, %s16_s10, [#allocation4], %s678_s19, %s678_s19, %s679_s20  }
  0x13   :  { %s680_s23 = smov [#allocation6]   ;;  %s627_s27 = scalar_lea.hbm %s841_s1, 8192 }
  0x14   :  { %s27_s24 = sshll.u32 %s680_s23, 4  ;;  %p628_p8 = scmp.ne.s32.totalorder %s841_s1, %s627_s27  ;;  %s28_s24 = int_to_ptr.vmem [resolvable:$true] %s27_s24 }
  0x15   :  { %p631_p9 = scmp.lt.u32.totalorder %s627_s27, %s841_s1 }
  0x17   :  { %p633_p10 = pnand %p631_p9, %p628_p8 }
  0x19   :  { %636 = shalt.err (!%p633_p10)
}
  0x1a   :  { %s637_s4 = scalar_lea.vmem %s28_s24, 8192  ;;  %p642_p12 = scmp.lt.s32.totalorder %s28_s24, %s28_s24 }
  0x1b   :  { %p638_p11 = scmp.ne.s32.totalorder %s28_s24, %s637_s4  ;;  %p643_p13 = scmp.lt.s32.totalorder %s637_s4, %s637_s4 }
  0x1d   :  { %p644_p0 = por %p643_p13, %p642_p12 }
  0x1f   :  { %p645_p1 = pnand %p644_p0, %p638_p11 }
  0x21   :  { %648 = shalt.err (!%p645_p1)
}
  0x22   :  { %33 = dma.hbm_to_vmem [thread:$0]  %s841_s1, 8192, %s28_s24, [#allocation7], %s678_s19, %s678_s19, %s679_s20  }
  0x23   :  { %671 = dma.done.wait [#allocation4], 1024  }
  0x24   :  { %672 = vsyncadd [#allocation4], 4294966272 }
  0x25   :  { %673 = dma.done.wait [#allocation7], 8192  }
  0x26   :  { %674 = vsyncadd [#allocation7], 4294959104  ;;  %v58_v0 = vld [vmem:[#allocation6 + $0x8] sm:$0xff]  ;;  %v60_v1 = vld [vmem:[#allocation6 + $0x18] sm:$0xff]  ;;  %vm236_vm0 = vcmask 1041409   ;;  %vm238_vm1 = vcmask 1043459  }
  0x27   :  { %v57_v2 = vld [vmem:[#allocation6] sm:$0xff]  ;;  %v502_v3 = vpack.c.bf16 %v60_v1, %v58_v0  ;;  %v59_v4 = vld [vmem:[#allocation6 + $0x10] sm:$0xff]  ;;  %v62_v5 = vld [vmem:[#allocation6 + $0x28] sm:$0xff]  ;;  %vm240_vm2 = vcmask 1045509   ;;  %vm242_vm3 = vcmask 1047559   ;;  %s683_s1 = smov [#allocation8]  }
  0x28   :  { %v64_v6 = vld [vmem:[#allocation6 + $0x38] sm:$0xff]  ;;  %v504_v7 = vpack.c.bf16 %v59_v4, %v57_v2  ;;  %v61_v9 = vld [vmem:[#allocation6 + $0x20] sm:$0xff]  ;;  %v63_v10 = vld [vmem:[#allocation6 + $0x30] sm:$0xff]  ;;  %s492_s6 = sshll.u32 %s683_s1, 4  ;;  %s493_s6 = int_to_ptr.vmem [resolvable:$true] %s492_s6 }
  0x29   :  { %v506_v8 = vpack.c.bf16 %v64_v6, %v62_v5  ;;  %v66_v11 = vld [vmem:[#allocation6 + $0x48] sm:$0xff]  ;;  %503 = vmatprep.subr.bf16.mxu0 %v502_v3  ;;  %566 = vmatprep.subr.bf16.mxu1 %v502_v3  ;;  %v68_v12 = vld [vmem:[#allocation6 + $0x58] sm:$0xff]  ;;  %v508_v13 = vpack.c.bf16 %v63_v10, %v61_v9  ;;  %v65_v15 = vld [vmem:[#allocation6 + $0x40] sm:$0xff]  ;;  %s649_s7 = scalar_lea.vmem %s493_s6, 512  ;;  %p654_p3 = scmp.lt.s32.totalorder %s493_s6, %s493_s6 }
  0x2a   :  { %505 = vmatpush1.bf16.msra.mxu0 %v504_v7  ;;  %582 = vmatpush1.bf16.msra.mxu1 %v504_v7  ;;  %v510_v14 = vpack.c.bf16 %v68_v12, %v66_v11  ;;  %v67_v16 = vld [vmem:[#allocation6 + $0x50] sm:$0xff]  ;;  %v70_v17 = vld [vmem:[#allocation6 + $0x68] sm:$0xff]  ;;  %v72_v18 = vld [vmem:[#allocation6 + $0x78] sm:$0xff]  ;;  %p650_p2 = scmp.ne.s32.totalorder %s493_s6, %s649_s7  ;;  %p655_p4 = scmp.lt.s32.totalorder %s649_s7, %s649_s7 }
  0x2b   :  { %507 = vmatprep.subr.bf16.mxu0 %v506_v8  ;;  %567 = vmatprep.subr.bf16.mxu1 %v506_v8  ;;  %v512_v19 = vpack.c.bf16 %v67_v16, %v65_v15  ;;  %v514_v20 = vpack.c.bf16 %v72_v18, %v70_v17  ;;  %v69_v21 = vld [vmem:[#allocation6 + $0x60] sm:$0xff]  ;;  %v71_v22 = vld [vmem:[#allocation6 + $0x70] sm:$0xff]  ;;  %v74_v23 = vld [vmem:[#allocation6 + $0x88] sm:$0xff] }
  0x2c   :  { %v76_v24 = vld [vmem:[#allocation6 + $0x98] sm:$0xff]  ;;  %v516_v25 = vpack.c.bf16 %v71_v22, %v69_v21  ;;  %v73_v27 = vld [vmem:[#allocation6 + $0x80] sm:$0xff]  ;;  %v75_v28 = vld [vmem:[#allocation6 + $0x90] sm:$0xff]  ;;  %p656_p5 = por %p655_p4, %p654_p3 }
  0x2d   :  { %v518_v26 = vpack.c.bf16 %v76_v24, %v74_v23  ;;  %v78_v29 = vld [vmem:[#allocation6 + $0xa8] sm:$0xff]  ;;  %v80_v30 = vld [vmem:[#allocation6 + $0xb8] sm:$0xff]  ;;  %v520_v31 = vpack.c.bf16 %v75_v28, %v73_v27  ;;  %v77_v33 = vld [vmem:[#allocation6 + $0xa0] sm:$0xff] }
  0x2e   :  { %509 = vmatpush1.bf16.msra.mxu0 %v508_v13  ;;  %583 = vmatpush1.bf16.msra.mxu1 %v508_v13  ;;  %v522_v32 = vpack.c.bf16 %v80_v30, %v78_v29  ;;  %v79_v34 = vld [vmem:[#allocation6 + $0xb0] sm:$0xff]  ;;  %v82_v35 = vld [vmem:[#allocation6 + $0xc8] sm:$0xff]  ;;  %v84_v36 = vld [vmem:[#allocation6 + $0xd8] sm:$0xff]  ;;  %p657_p6 = pnand %p656_p5, %p650_p2 }
  0x2f   :  { %511 = vmatprep.subr.bf16.mxu0 %v510_v14  ;;  %568 = vmatprep.subr.bf16.mxu1 %v510_v14  ;;  %v524_v37 = vpack.c.bf16 %v79_v34, %v77_v33  ;;  %v81_v38 = vld [vmem:[#allocation6 + $0xc0] sm:$0xff]  ;;  %v526_v39 = vpack.c.bf16 %v84_v36, %v82_v35  ;;  %v83_v40 = vld [vmem:[#allocation6 + $0xd0] sm:$0xff]  ;;  %v50_v41 = vld [vmem:[#allocation3 + $0x8] sm:$0xff] }
  0x30   :  { %v54_v42 = vld [vmem:[#allocation3 + $0x28] sm:$0xff]  ;;  %v88_v44 = vld [vmem:[#allocation6 + $0xf8] sm:$0xff]  ;;  %185 = vmatprep.mubr.f32.mxu0 %v50_v41  ;;  %v528_v45 = vpack.c.bf16 %v83_v40, %v81_v38  ;;  %v85_v47 = vld [vmem:[#allocation6 + $0xe0] sm:$0xff]  ;;  %v681_v40 = vmov 0.0   ;;  %v682_v41 = vmov 1983009808  }
  0x31   :  { %v86_v43 = vld [vmem:[#allocation6 + $0xe8] sm:$0xff]  ;;  %197 = vmatprep.mubr.f32.mxu1 %v54_v42  ;;  %v87_v48 = vld [vmem:[#allocation6 + $0xf0] sm:$0xff]  ;;  %v92_v50 = vld [vmem:[#allocation6 + $0x118] sm:$0xff]  ;;  %44 = vst [vmem:[#allocation2] sm:$0xff] %v681_v40  ;;  %v217_v42 = vunpack.c.l.s4 %v682_v41 }
  0x32   :  { %513 = vmatpush1.bf16.msra.mxu0 %v512_v19  ;;  %584 = vmatpush1.bf16.msra.mxu1 %v512_v19  ;;  %v530_v46 = vpack.c.bf16 %v88_v44, %v86_v43  ;;  %v90_v49 = vld [vmem:[#allocation6 + $0x108] sm:$0xff]  ;;  %v532_v51 = vpack.c.bf16 %v87_v48, %v85_v47  ;;  %v89_v53 = vld [vmem:[#allocation6 + $0x100] sm:$0xff]  ;;  %v91_v54 = vld [vmem:[#allocation6 + $0x110] sm:$0xff]  ;;  %45 = vst [vmem:[#allocation2 + $0x8] sm:$0xff] %v681_v40  ;;  %v219_v43 = vlaneseq }
  0x33   :  { %515 = vmatprep.subr.bf16.mxu0 %v514_v20  ;;  %569 = vmatprep.subr.bf16.mxu1 %v514_v20  ;;  %v534_v52 = vpack.c.bf16 %v92_v50, %v90_v49  ;;  %v94_v55 = vld [vmem:[#allocation6 + $0x128] sm:$0xff]  ;;  %v96_v56 = vld [vmem:[#allocation6 + $0x138] sm:$0xff]  ;;  %v536_v57 = vpack.c.bf16 %v91_v54, %v89_v53  ;;  %v93_v59 = vld [vmem:[#allocation6 + $0x120] sm:$0xff]  ;;  %46 = vst [vmem:[#allocation2 + $0x10] sm:$0xff] %v681_v40  ;;  %v218_v44 = vunpack.c.0.s8 %v217_v42 }
  0x34   :  { %v538_v58 = vpack.c.bf16 %v96_v56, %v94_v55  ;;  %v95_v60 = vld [vmem:[#allocation6 + $0x130] sm:$0xff]  ;;  %v98_v61 = vld [vmem:[#allocation6 + $0x148] sm:$0xff]  ;;  %v100_v62 = vld [vmem:[#allocation6 + $0x158] sm:$0xff]  ;;  %47 = vst [vmem:[#allocation2 + $0x18] sm:$0xff] %v681_v40 }
  0x35   :  { %v540_v63 = vpack.c.bf16 %v95_v60, %v93_v59  ;;  %v542_v0 = vpack.c.bf16 %v100_v62, %v98_v61  ;;  %v97_v1 = vld [vmem:[#allocation6 + $0x140] sm:$0xff]  ;;  %v99_v2 = vld [vmem:[#allocation6 + $0x150] sm:$0xff]  ;;  %v102_v3 = vld [vmem:[#allocation6 + $0x168] sm:$0xff]  ;;  %48 = vst [vmem:[#allocation2 + $0x20] sm:$0xf] %v681_v40 }
  0x36   :  { %517 = vmatpush1.bf16.msra.mxu0 %v516_v25  ;;  %585 = vmatpush1.bf16.msra.mxu1 %v516_v25  ;;  %v104_v4 = vld [vmem:[#allocation6 + $0x178] sm:$0xff]  ;;  %v544_v5 = vpack.c.bf16 %v99_v2, %v97_v1  ;;  %v101_v7 = vld [vmem:[#allocation6 + $0x160] sm:$0xff]  ;;  %v103_v8 = vld [vmem:[#allocation6 + $0x170] sm:$0xff] }
  0x37   :  { %519 = vmatprep.subr.bf16.mxu0 %v518_v26  ;;  %570 = vmatprep.subr.bf16.mxu1 %v518_v26  ;;  %v546_v6 = vpack.c.bf16 %v104_v4, %v102_v3  ;;  %v106_v9 = vld [vmem:[#allocation6 + $0x188] sm:$0xff]  ;;  %v108_v10 = vld [vmem:[#allocation6 + $0x198] sm:$0xff]  ;;  %v548_v11 = vpack.c.bf16 %v103_v8, %v101_v7  ;;  %v105_v13 = vld [vmem:[#allocation6 + $0x180] sm:$0xff] }
  0x38   :  { %v550_v12 = vpack.c.bf16 %v108_v10, %v106_v9  ;;  %v107_v14 = vld [vmem:[#allocation6 + $0x190] sm:$0xff]  ;;  %v110_v15 = vld [vmem:[#allocation6 + $0x1a8] sm:$0xff]  ;;  %v112_v16 = vld [vmem:[#allocation6 + $0x1b8] sm:$0xff] }
  0x39   :  { %v552_v17 = vpack.c.bf16 %v107_v14, %v105_v13  ;;  %v554_v18 = vpack.c.bf16 %v112_v16, %v110_v15  ;;  %v109_v19 = vld [vmem:[#allocation6 + $0x1a0] sm:$0xff]  ;;  %v111_v20 = vld [vmem:[#allocation6 + $0x1b0] sm:$0xff]  ;;  %v114_v21 = vld [vmem:[#allocation6 + $0x1c8] sm:$0xff] }
  0x3a   :  { %521 = vmatpush1.bf16.msra.mxu0 %v520_v31  ;;  %586 = vmatpush1.bf16.msra.mxu1 %v520_v31  ;;  %v116_v22 = vld [vmem:[#allocation6 + $0x1d8] sm:$0xff]  ;;  %v556_v23 = vpack.c.bf16 %v111_v20, %v109_v19  ;;  %v113_v25 = vld [vmem:[#allocation6 + $0x1c0] sm:$0xff]  ;;  %v115_v26 = vld [vmem:[#allocation6 + $0x1d0] sm:$0xff] }
  0x3b   :  { %523 = vmatprep.subr.bf16.mxu0 %v522_v32  ;;  %571 = vmatprep.subr.bf16.mxu1 %v522_v32  ;;  %v558_v24 = vpack.c.bf16 %v116_v22, %v114_v21  ;;  %v118_v27 = vld [vmem:[#allocation6 + $0x1e8] sm:$0xff]  ;;  %v120_v28 = vld [vmem:[#allocation6 + $0x1f8] sm:$0xff]  ;;  %v560_v29 = vpack.c.bf16 %v115_v26, %v113_v25  ;;  %v117_v31 = vld [vmem:[#allocation6 + $0x1e0] sm:$0xff] }
  0x3c   :  { %v562_v30 = vpack.c.bf16 %v120_v28, %v118_v27  ;;  %v119_v32 = vld [vmem:[#allocation6 + $0x1f0] sm:$0xff]  ;;  %v49_v34 = vld [vmem:[#allocation3] sm:$0xff]  ;;  %v52_v36 = vld [vmem:[#allocation3 + $0x18] sm:$0xff] }
  0x3d   :  { %v564_v33 = vpack.c.bf16 %v119_v32, %v117_v31  ;;  %v53_v35 = vld [vmem:[#allocation3 + $0x20] sm:$0xff]  ;;  %v51_v38 = vld [vmem:[#allocation3 + $0x10] sm:$0xff]  ;;  %v210_v15 = vld [vmem:[#allocation2] sm:$0xf] }
  0x3e   :  { %525 = vmatpush1.bf16.msra.mxu0 %v524_v37  ;;  %587 = vmatpush1.bf16.msra.mxu1 %v524_v37  ;;  %v56_v37 = vld [vmem:[#allocation3 + $0x38] sm:$0xff] }
  0x3f   :  { %527 = vmatprep.subr.bf16.mxu0 %v526_v39  ;;  %572 = vmatprep.subr.bf16.mxu1 %v526_v39  ;;  %v55_v39 = vld [vmem:[#allocation3 + $0x30] sm:$0xff] }
  0x42   :  { %529 = vmatpush1.bf16.msra.mxu0 %v528_v45  ;;  %588 = vmatpush1.bf16.msra.mxu1 %v528_v45  ;;  %v220_v45 = vshrl.u32 %v219_v43, 7 }
  0x43   :  { %531 = vmatprep.subr.bf16.mxu0 %v530_v46  ;;  %573 = vmatprep.subr.bf16.mxu1 %v530_v46 }
  0x44   :  { %v728_v48 = vsub.s32 %v218_v44, %v220_v45 }
  0x46   :  { %533 = vmatpush1.bf16.msra.mxu0 %v532_v51  ;;  %589 = vmatpush1.bf16.msra.mxu1 %v532_v51 }
  0x47   :  { %535 = vmatprep.subr.bf16.mxu0 %v534_v52  ;;  %574 = vmatprep.subr.bf16.mxu1 %v534_v52 }
  0x4a   :  { %537 = vmatpush1.bf16.msra.mxu0 %v536_v57  ;;  %590 = vmatpush1.bf16.msra.mxu1 %v536_v57 }
  0x4b   :  { %539 = vmatprep.subr.bf16.mxu0 %v538_v58  ;;  %575 = vmatprep.subr.bf16.mxu1 %v538_v58 }
  0x4e   :  { %541 = vmatpush1.bf16.msra.mxu0 %v540_v63  ;;  %591 = vmatpush1.bf16.msra.mxu1 %v540_v63 }
  0x4f   :  { %543 = vmatprep.subr.bf16.mxu0 %v542_v0  ;;  %576 = vmatprep.subr.bf16.mxu1 %v542_v0 }
  0x52   :  { %545 = vmatpush1.bf16.msra.mxu0 %v544_v5  ;;  %592 = vmatpush1.bf16.msra.mxu1 %v544_v5 }
  0x53   :  { %547 = vmatprep.subr.bf16.mxu0 %v546_v6  ;;  %577 = vmatprep.subr.bf16.mxu1 %v546_v6 }
  0x56   :  { %549 = vmatpush1.bf16.msra.mxu0 %v548_v11  ;;  %593 = vmatpush1.bf16.msra.mxu1 %v548_v11 }
  0x57   :  { %551 = vmatprep.subr.bf16.mxu0 %v550_v12  ;;  %578 = vmatprep.subr.bf16.mxu1 %v550_v12 }
  0x5a   :  { %553 = vmatpush1.bf16.msra.mxu0 %v552_v17  ;;  %594 = vmatpush1.bf16.msra.mxu1 %v552_v17 }
  0x5b   :  { %555 = vmatprep.subr.bf16.mxu0 %v554_v18  ;;  %579 = vmatprep.subr.bf16.mxu1 %v554_v18 }
  0x5e   :  { %557 = vmatpush1.bf16.msra.mxu0 %v556_v23  ;;  %595 = vmatpush1.bf16.msra.mxu1 %v556_v23 }
  0x5f   :  { %559 = vmatprep.subr.bf16.mxu0 %v558_v24  ;;  %580 = vmatprep.subr.bf16.mxu1 %v558_v24 }
  0x62   :  { %561 = vmatpush1.bf16.msra.mxu0 %v560_v29  ;;  %596 = vmatpush1.bf16.msra.mxu1 %v560_v29 }
  0x63   :  { %563 = vmatprep.subr.bf16.mxu0 %v562_v30  ;;  %581 = vmatprep.subr.bf16.mxu1 %v562_v30 }
  0x66   :  { %565 = vmatpush1.bf16.msra.mxu0 %v564_v33  ;;  %597 = vmatpush1.bf16.msra.mxu1 %v564_v33 }
  0x69   :  { %186 = vmatmul.mubr.f32.vlgmr.msra.gmra.mrb[0].mxu0 %v49_v34  ;;  %198 = vmatmul.mubr.f32.vlgmr.msra.gmra.mrb[0].mxu1 %v53_v35 }
  0x6a   :  { %191 = vmatprep.mubr.f32.mxu0 %v52_v36  ;;  %203 = vmatprep.mubr.f32.mxu1 %v56_v37 }
  0x6d   :  { %192 = vmatmul.mubr.f32.gmra.mrb[2].mxu0 %v51_v38  ;;  %204 = vmatmul.mubr.f32.gmra.mrb[2].mxu1 %v55_v39 }
 0x13c   :  { %v187_v46 = vpop.f32.mrb[0].mxu0  ;;  %v199_v47 = vpop.f32.mrb[0].mxu1 }
 0x13d   :  { %v189_v49 = vpop.f32.mrb[1].mxu0  ;;  %v201_v50 = vpop.f32.mrb[1].mxu1 }
 0x13e   :  { %v215_v51 = vcombine.low %v187_v46, %v189_v49  ;;  %v283_v52 = vcombine.high %v187_v46, %v189_v49  ;;  %v223_v53 = vcombine.low %v199_v47, %v201_v50  ;;  %v291_v54 = vcombine.high %v199_v47, %v201_v50 }
 0x140   :  { %v222_v55 = vrot.slane %v215_v51, %v728_v48  ;;  %v290_v56 = vrot.slane %v283_v52, %v728_v48  ;;  %v230_v57 = vrot.slane %v223_v53, %v728_v48  ;;  %v298_v58 = vrot.slane %v291_v54, %v728_v48  ;;  %v193_v59 = vpop.f32.mrb[2].mxu0  ;;  %v734_v60 = vpop.f32.mrb[2].mxu1 }
 0x141   :  { %v195_v61 = vpop.f32.mrb[3].mxu0  ;;  %v207_v62 = vpop.f32.mrb[3].mxu1 }
 0x142   :  { %v248_v63 = vrot.slane %v222_v55, 1  ;;  %v259_v0 = vcombine.high %v222_v55, %v222_v55  ;;  %v310_v1 = vrot.slane %v290_v56, 1  ;;  %v321_v2 = vcombine.high %v290_v56, %v290_v56 }
 0x143   :  { %v235_v3 = vrot.slane %v230_v57, 7  ;;  %v260_v4 = vcombine.high %v230_v57, %v230_v57  ;;  %v301_v5 = vrot.slane %v298_v58, 7  ;;  %v322_v6 = vcombine.high %v298_v58, %v298_v58 }
 0x144   :  { %v272_v7 = vrot.slane %v259_v0, 1  ;;  %v334_v8 = vrot.slane %v321_v2, 1  ;;  %v251_v9 = vsel %vm236_vm0, %v230_v57, %v248_v63  ;;  %v313_v10 = vsel %vm236_vm0, %v298_v58, %v310_v1 }
 0x145   :  { %v237_v11 = vsel %vm236_vm0, %v235_v3, %v222_v55  ;;  %v252_v12 = vsel %vm238_vm1, %v230_v57, %v251_v9  ;;  %v263_v13 = vrot.slane %v260_v4, 7  ;;  %v302_v14 = vsel %vm236_vm0, %v301_v5, %v290_v56 }
 0x146   :  { %v239_v16 = vsel %vm238_vm1, %v235_v3, %v237_v11  ;;  %v253_v17 = vsel %vm240_vm2, %v230_v57, %v252_v12  ;;  %v275_v18 = vsel %vm236_vm0, %v260_v4, %v272_v7  ;;  %v303_v19 = vsel %vm238_vm1, %v301_v5, %v302_v14 }
 0x147   :  { %v241_v20 = vsel %vm240_vm2, %v235_v3, %v239_v16  ;;  %v254_v21 = vsel %vm242_vm3, %v230_v57, %v253_v17  ;;  %v264_v22 = vsel %vm236_vm0, %v263_v13, %v259_v0  ;;  %v276_v23 = vsel %vm238_vm1, %v260_v4, %v275_v18 }
 0x148   :  { %v243_v24 = vsel %vm242_vm3, %v235_v3, %v241_v20  ;;  %v265_v25 = vsel %vm238_vm1, %v263_v13, %v264_v22  ;;  %v277_v26 = vsel %vm240_vm2, %v260_v4, %v276_v23  ;;  %v304_v27 = vsel %vm240_vm2, %v301_v5, %v303_v19 }
 0x149   :  { %v245_v28 = vadd.f32 %v243_v24, %v210_v15  ;;  %v266_v29 = vsel %vm240_vm2, %v263_v13, %v265_v25  ;;  %v755_v30 = vsel %vm242_vm3, %v260_v4, %v277_v26  ;;  %v758_v31 = vsel %vm242_vm3, %v301_v5, %v304_v27 }
 0x14a   :  { %v761_v32 = vsel %vm242_vm3, %v263_v13, %v266_v29  ;;  %v314_v33 = vsel %vm238_vm1, %v298_v58, %v313_v10  ;;  %v325_v34 = vrot.slane %v322_v6, 7  ;;  %v337_v35 = vsel %vm236_vm0, %v322_v6, %v334_v8 }
 0x14b   :  { %246 = vst [vmem:[#allocation2] sm:$0xf] %v245_v28  ;;  %v315_v36 = vsel %vm240_vm2, %v298_v58, %v314_v33  ;;  %v338_v37 = vsel %vm238_vm1, %v322_v6, %v337_v35  ;;  %v349_v38 = vcombine.low %v193_v59, %v195_v61  ;;  %v411_v39 = vcombine.high %v193_v59, %v195_v61 }
 0x14c   :  { %v768_v41 = vsel %vm242_vm3, %v298_v58, %v315_v36  ;;  %v326_v42 = vsel %vm236_vm0, %v325_v34, %v321_v2  ;;  %v339_v43 = vsel %vm240_vm2, %v322_v6, %v338_v37  ;;  %v357_v44 = vcombine.low %v734_v60, %v207_v62 }
 0x14d   :  { %v327_v45 = vsel %vm238_vm1, %v325_v34, %v326_v42  ;;  %v775_v46 = vsel %vm242_vm3, %v322_v6, %v339_v43  ;;  %v356_v47 = vrot.slane %v349_v38, %v728_v48  ;;  %v418_v49 = vrot.slane %v411_v39, %v728_v48 }
 0x14e   :  { %v328_v50 = vsel %vm240_vm2, %v325_v34, %v327_v45  ;;  %v364_v51 = vrot.slane %v357_v44, %v728_v48  ;;  %v419_v52 = vcombine.high %v734_v60, %v207_v62 }
 0x14f   :  { %v783_v53 = vsel %vm242_vm3, %v325_v34, %v328_v50  ;;  %v376_v54 = vrot.slane %v356_v47, 1  ;;  %v387_v55 = vcombine.high %v356_v47, %v356_v47  ;;  %v449_v56 = vcombine.high %v418_v49, %v418_v49 }
 0x150   :  { %v367_v57 = vrot.slane %v364_v51, 7  ;;  %v388_v58 = vcombine.high %v364_v51, %v364_v51  ;;  %v426_v59 = vrot.slane %v419_v52, %v728_v48  ;;  %v438_v63 = vrot.slane %v418_v49, 1 }
 0x151   :  { %v400_v61 = vrot.slane %v387_v55, 1  ;;  %v379_v0 = vsel %vm236_vm0, %v364_v51, %v376_v54  ;;  %v462_v2 = vrot.slane %v449_v56, 1 }
 0x152   :  { %v247_v1 = vld [vmem:[#allocation2 + $0x2] sm:$0xf]  ;;  %v368_v3 = vsel %vm236_vm0, %v367_v57, %v356_v47  ;;  %v380_v60 = vsel %vm238_vm1, %v364_v51, %v379_v0  ;;  %v391_v62 = vrot.slane %v388_v58, 7  ;;  %v429_v14 = vrot.slane %v426_v59, 7 }
 0x153   :  { %v256_v4 = vadd.f32 %v254_v21, %v247_v1  ;;  %v369_v5 = vsel %vm238_vm1, %v367_v57, %v368_v3  ;;  %v381_v6 = vsel %vm240_vm2, %v364_v51, %v380_v60  ;;  %v403_v7 = vsel %vm236_vm0, %v388_v58, %v400_v61 }
 0x154   :  { %v370_v48 = vsel %vm240_vm2, %v367_v57, %v369_v5  ;;  %v382_v8 = vsel %vm242_vm3, %v364_v51, %v381_v6  ;;  %v392_v9 = vsel %vm236_vm0, %v391_v62, %v387_v55  ;;  %v404_v10 = vsel %vm238_vm1, %v388_v58, %v403_v7 }
 0x155   :  { %257 = vst [vmem:[#allocation2 + $0x2] sm:$0xf] %v256_v4  ;;  %v371_v11 = vsel %vm242_vm3, %v367_v57, %v370_v48  ;;  %v393_v12 = vsel %vm238_vm1, %v391_v62, %v392_v9  ;;  %v405_v13 = vsel %vm240_vm2, %v388_v58, %v404_v10  ;;  %v441_v17 = vsel %vm236_vm0, %v426_v59, %v438_v63 }
 0x156   :  { %v394_v15 = vsel %vm240_vm2, %v391_v62, %v393_v12  ;;  %v406_v16 = vsel %vm242_vm3, %v388_v58, %v405_v13  ;;  %v450_v18 = vcombine.high %v426_v59, %v426_v59  ;;  %v430_v20 = vsel %vm236_vm0, %v429_v14, %v418_v49 }
 0x157   :  { %v395_v19 = vsel %vm242_vm3, %v391_v62, %v394_v15  ;;  %v442_v21 = vsel %vm238_vm1, %v426_v59, %v441_v17  ;;  %v431_v22 = vsel %vm238_vm1, %v429_v14, %v430_v20 }
 0x158   :  { %v443_v23 = vsel %vm240_vm2, %v426_v59, %v442_v21  ;;  %v453_v24 = vrot.slane %v450_v18, 7  ;;  %v465_v25 = vsel %vm236_vm0, %v450_v18, %v462_v2  ;;  %v432_v26 = vsel %vm240_vm2, %v429_v14, %v431_v22 }
 0x159   :  { %v444_v27 = vsel %vm242_vm3, %v426_v59, %v443_v23  ;;  %v466_v28 = vsel %vm238_vm1, %v450_v18, %v465_v25  ;;  %v433_v29 = vsel %vm242_vm3, %v429_v14, %v432_v26 }
 0x15a   :  { %v454_v33 = vsel %vm236_vm0, %v453_v24, %v449_v56  ;;  %v467_v34 = vsel %vm240_vm2, %v450_v18, %v466_v28 }
 0x15b   :  { %v455_v35 = vsel %vm238_vm1, %v453_v24, %v454_v33  ;;  %v468_v36 = vsel %vm242_vm3, %v450_v18, %v467_v34 }
 0x15c   :  { %v258_v37 = vld [vmem:[#allocation2 + $0x4] sm:$0xf]  ;;  %v456_v38 = vsel %vm240_vm2, %v453_v24, %v455_v35 }
 0x15d   :  { %v269_v39 = vadd.f32 %v761_v32, %v258_v37  ;;  %v457_v42 = vsel %vm242_vm3, %v453_v24, %v456_v38 }
 0x15f   :  { %270 = vst [vmem:[#allocation2 + $0x4] sm:$0xf] %v269_v39 }
 0x166   :  { %v271_v43 = vld [vmem:[#allocation2 + $0x6] sm:$0xf] }
 0x167   :  { %v280_v44 = vadd.f32 %v755_v30, %v271_v43 }
 0x169   :  { %281 = vst [vmem:[#allocation2 + $0x6] sm:$0xf] %v280_v44 }
 0x170   :  { %v282_v45 = vld [vmem:[#allocation2 + $0x8] sm:$0xf]  ;;  %v472_v47 = vld [vmem:[#allocation2] sm:$0xff] }
 0x171   :  { %v307_v49 = vadd.f32 %v758_v31, %v282_v45  ;;  %476 = vst [vmem:[#allocation8] sm:$0xff] %v472_v47 }
 0x173   :  { %308 = vst [vmem:[#allocation2 + $0x8] sm:$0xf] %v307_v49 }
 0x17a   :  { %v309_v50 = vld [vmem:[#allocation2 + $0xa] sm:$0xf] }
 0x17b   :  { %v318_v51 = vadd.f32 %v768_v41, %v309_v50 }
 0x17d   :  { %319 = vst [vmem:[#allocation2 + $0xa] sm:$0xf] %v318_v51 }
 0x184   :  { %v320_v52 = vld [vmem:[#allocation2 + $0xc] sm:$0xf] }
 0x185   :  { %v331_v32 = vadd.f32 %v783_v53, %v320_v52 }
 0x187   :  { %332 = vst [vmem:[#allocation2 + $0xc] sm:$0xf] %v331_v32 }
 0x18e   :  { %v333_v54 = vld [vmem:[#allocation2 + $0xe] sm:$0xf] }
 0x18f   :  { %v342_v55 = vadd.f32 %v775_v46, %v333_v54 }
 0x191   :  { %343 = vst [vmem:[#allocation2 + $0xe] sm:$0xf] %v342_v55 }
 0x198   :  { %v344_v30 = vld [vmem:[#allocation2 + $0x10] sm:$0xf]  ;;  %v473_v56 = vld [vmem:[#allocation2 + $0x8] sm:$0xff] }
 0x199   :  { %v373_v57 = vadd.f32 %v371_v11, %v344_v30  ;;  %477 = vst [vmem:[#allocation8 + $0x8] sm:$0xff] %v473_v56  ;;  %482 = vst [vmem:[#allocation2 + $0x4] sm:$0xff] %v681_v40 }
 0x19b   :  { %374 = vst [vmem:[#allocation2 + $0x10] sm:$0xf] %v373_v57 }
 0x1a2   :  { %v375_v31 = vld [vmem:[#allocation2 + $0x12] sm:$0xf] }
 0x1a3   :  { %v384_v58 = vadd.f32 %v382_v8, %v375_v31 }
 0x1a5   :  { %385 = vst [vmem:[#allocation2 + $0x12] sm:$0xf] %v384_v58 }
 0x1ac   :  { %v386_v41 = vld [vmem:[#allocation2 + $0x14] sm:$0xf] }
 0x1ad   :  { %v397_v59 = vadd.f32 %v395_v19, %v386_v41 }
 0x1af   :  { %398 = vst [vmem:[#allocation2 + $0x14] sm:$0xf] %v397_v59 }
 0x1b6   :  { %v399_v61 = vld [vmem:[#allocation2 + $0x16] sm:$0xf] }
 0x1b7   :  { %v408_v53 = vadd.f32 %v406_v16, %v399_v61 }
 0x1b9   :  { %409 = vst [vmem:[#allocation2 + $0x16] sm:$0xf] %v408_v53 }
 0x1c0   :  { %v410_v63 = vld [vmem:[#allocation2 + $0x18] sm:$0xf]  ;;  %v474_v0 = vld [vmem:[#allocation2 + $0x10] sm:$0xff] }
 0x1c1   :  { %v435_v46 = vadd.f32 %v433_v29, %v410_v63  ;;  %478 = vst [vmem:[#allocation8 + $0x10] sm:$0xff] %v474_v0  ;;  %483 = vst [vmem:[#allocation2 + $0xc] sm:$0xff] %v681_v40 }
 0x1c3   :  { %436 = vst [vmem:[#allocation2 + $0x18] sm:$0xf] %v435_v46 }
 0x1ca   :  { %v437_v1 = vld [vmem:[#allocation2 + $0x1a] sm:$0xf] }
 0x1cb   :  { %v446_v2 = vadd.f32 %v444_v27, %v437_v1 }
 0x1cd   :  { %447 = vst [vmem:[#allocation2 + $0x1a] sm:$0xf] %v446_v2 }
 0x1d4   :  { %v448_v3 = vld [vmem:[#allocation2 + $0x1c] sm:$0xf] }
 0x1d5   :  { %v459_v60 = vadd.f32 %v457_v42, %v448_v3 }
 0x1d7   :  { %460 = vst [vmem:[#allocation2 + $0x1c] sm:$0xf] %v459_v60 }
 0x1de   :  { %v461_v62 = vld [vmem:[#allocation2 + $0x1e] sm:$0xf] }
 0x1df   :  { %v470_v4 = vadd.f32 %v468_v36, %v461_v62 }
 0x1e1   :  { %471 = vst [vmem:[#allocation2 + $0x1e] sm:$0xf] %v470_v4 }
 0x1e8   :  { %v475_v5 = vld [vmem:[#allocation2 + $0x18] sm:$0xff]  ;;  %v480_v6 = vld [vmem:[#allocation2 + $0x20] sm:$0xf] }
 0x1e9   :  { %479 = vst [vmem:[#allocation8 + $0x18] sm:$0xff] %v475_v5  ;;  %481 = vst [vmem:[#allocation2] sm:$0xf] %v480_v6 }
 0x1ea   :  { %484 = vst [vmem:[#allocation2 + $0x14] sm:$0xff] %v681_v40  ;;  %485 = vst [vmem:[#allocation2 + $0x1c] sm:$0xff] %v681_v40 }
 0x1eb   :  { %660 = shalt.err (!%p657_p6)
}
 0x1ec   :  { %s661_s10 = scalar_lea.hbm %s842_s2, 512 }
 0x1ed   :  { %p662_p7 = scmp.ne.s32.totalorder %s842_s2, %s661_s10  ;;  %p665_p8 = scmp.lt.u32.totalorder %s661_s10, %s842_s2 }
 0x1ef   :  { %p667_p9 = pnand %p665_p8, %p662_p7 }
 0x1f1   :  { %670 = shalt.err (!%p667_p9)
}
 0x1f2   :  { %495 = dma.vmem_to_hbm [thread:$0]  %s493_s6, 512, %s842_s2, [#allocation5]  }
 0x1f3   :  { %675 = dma.done.wait [#allocation5], 512  }
 0x1f4   :  { %676 = vsyncadd [#allocation5], 4294966784 }
 0x1f5   :  { %499 = vsyncpa [#allocation4], 1 }
 0x1f6   :  { %500 = vsyncpa [#allocation7], 1 }
 0x1f7   :  { %501 = vsyncpa [#allocation5], 1 }

</bundles_post_ra>
